<compile_context>
chip_gen: v6e
topology: v6e:2x2x1
jax: 0.10.0
libtpu: 0.0.40
codegen_flags: <defaults>
</compile_context>

<pallas_src>
import functools

import jax
import jax.numpy as jnp
from jax.experimental import pallas as pl
from jax.experimental.pallas import tpu as pltpu


def _fused_mlp_kernel(*refs, num_layers: int):
    """Fused multi-layer linear(+ReLU) chain, single VMEM-resident block.

    refs = (x, w0, b0, w1, b1, ..., w_{L-1}, b_{L-1}, out,
            wbuf_1, ..., wbuf_{L-1}, dma_sem)
      x:   [B, IN]        bf16
      w0:  [IN, H0]       bf16 (VMEM, auto-DMA)
      wi:  [Hi-1, Hi]     bf16 (HBM via pl.ANY, manual DMA), i >= 1
      bi:  [1, Hi]        f32
      out: [B, OUT_pad]   f32 (OUT_pad lane-dense, multiple of 128)
    """
    x_ref = refs[0]
    w_refs = [refs[1 + 2 * i] for i in range(num_layers)]
    b_refs = [refs[2 + 2 * i] for i in range(num_layers)]
    o_ref = refs[1 + 2 * num_layers]
    scratch = refs[2 + 2 * num_layers:]

    copies = []
    if num_layers > 1:
        w_bufs = list(scratch[: num_layers - 1])
        sem = scratch[num_layers - 1]
        # Kick off the DMAs for all later-layer weights now so they overlap the
        # layer-0 matmul (they are small; layer-0's weight is the big one and is
        # already in VMEM via the auto-pipelined BlockSpec).
        for i in range(num_layers - 1):
            cp = pltpu.make_async_copy(w_refs[i + 1], w_bufs[i], sem.at[i])
            cp.start()
            copies.append(cp)

    act = x_ref[...]  # bf16 [B, IN]
    for i in range(num_layers):
        if i == 0:
            w = w_refs[0][...]
        else:
            copies[i - 1].wait()
            w = w_bufs[i - 1][...]
        # bf16 operands, f32 accumulation on the MXU.
        y = jnp.dot(act.astype(jnp.bfloat16), w,
                    preferred_element_type=jnp.float32)
        y = y + b_refs[i][...]          # f32 epilogue (v5e VPU has no bf16)
        if i != num_layers - 1:
            y = jnp.maximum(y, 0.0)     # ReLU on hidden layers only
        act = y
    o_ref[...] = act.astype(o_ref.dtype)


def _fused_mlp_call(x2d_bf16, w_list, b_list):
    """x2d_bf16: [B, IN] bf16; w_list[i]: [in_i, out_i] bf16; b_list[i]: [1, out_i] f32."""
    B = x2d_bf16.shape[0]
    num_layers = len(w_list)
    out_pad = w_list[-1].shape[1]

    inputs = [x2d_bf16]
    in_specs = [pl.BlockSpec(memory_space=pltpu.MemorySpace.VMEM)]
    for i, (w, b) in enumerate(zip(w_list, b_list)):
        inputs.append(w)
        if i == 0:
            # First (largest) weight: regular VMEM input, DMA'd before kernel start.
            in_specs.append(pl.BlockSpec(memory_space=pltpu.MemorySpace.VMEM))
        else:
            # Later weights stay in HBM; copied manually inside the kernel so the
            # DMA overlaps earlier-layer compute.
            in_specs.append(pl.BlockSpec(memory_space=pl.ANY))
        inputs.append(b)
        in_specs.append(pl.BlockSpec(memory_space=pltpu.MemorySpace.VMEM))

    scratch_shapes = []
    if num_layers > 1:
        scratch_shapes += [pltpu.VMEM(w_list[i].shape, w_list[i].dtype)
                           for i in range(1, num_layers)]
        scratch_shapes.append(pltpu.SemaphoreType.DMA((num_layers - 1,)))

    kernel = functools.partial(_fused_mlp_kernel, num_layers=num_layers)
    return pl.pallas_call(
        kernel,
        out_shape=jax.ShapeDtypeStruct((B, out_pad), jnp.float32),
        in_specs=in_specs,
        out_specs=pl.BlockSpec(memory_space=pltpu.MemorySpace.VMEM),
        scratch_shapes=scratch_shapes,
        # Everything fits comfortably in VMEM at these sizes (<1 MiB total), so a
        # single gridless block is used on every generation (v5e/v6e/v7x).
        # TODO(synk): add a K/N-tiled gridded path for layers whose weights exceed
        # the v7x 64 MiB VMEM budget.
    )(*inputs)


def prepare_mlp_params(params, lane=128):
    """Cast weights to bf16 for the MXU; zero-pad the classifier to a lane-dense width."""
    n = len(params)
    w_list, b_list = [], []
    for i, (w, b) in enumerate(params):
        if i == n - 1 and (w.shape[1] % lane) != 0:
            pad = (-w.shape[1]) % lane
            w = jnp.pad(w, ((0, 0), (0, pad)))   # zero columns -> padded logits are 0
            b = jnp.pad(b, (0, pad))
        w_list.append(w.astype(jnp.bfloat16))
        b_list.append(b.reshape(1, -1).astype(jnp.float32))
    out_dim = params[-1][1].shape[0]
    return w_list, b_list, out_dim


def init_mlp_params(key, input_size, layer_sizes, num_classes, dtype=jnp.float32):
    """Deterministic init mirroring the torch module's parameter shapes.

    Returns a list of (w [in, out], b [out]) for:
      input_adapter Linear, hidden Linears, classifier Linear.
    """
    dims = [input_size] + list(layer_sizes) + [num_classes]
    params = []
    for i in range(len(dims) - 1):
        fan_in, fan_out = dims[i], dims[i + 1]
        key, kw, kb = jax.random.split(key, 3)
        bound = 1.0 / jnp.sqrt(jnp.asarray(fan_in, dtype))
        w = jax.random.uniform(kw, (fan_in, fan_out), dtype, -bound, bound)
        b = jax.random.uniform(kb, (fan_out,), dtype, -bound, bound)
        params.append((w, b))
    return params


def mlp_forward(x_nchw, params):
    """Forward pass equivalent to MLP.forward: [B, C, H, W] -> logits [B, num_classes]."""
    B = x_nchw.shape[0]
    x = x_nchw.reshape(B, -1).astype(jnp.bfloat16)   # nn.Flatten() + bf16 MXU operands
    w_list, b_list, out_dim = prepare_mlp_params(params)
    out_padded = _fused_mlp_call(x, w_list, b_list)
    return out_padded[:, :out_dim]


if __name__ == "__main__":
    # Small shapes consistent with the module: image-like input flattened into the MLP.
    B, C, H, W = 2, 4, 16, 16
    input_size = C * H * W            # 1024
    layer_sizes = [128, 64]
    num_classes = 10

    key = jax.random.PRNGKey(0)
    key, kx = jax.random.split(key)
    x = jax.random.normal(kx, (B, C, H, W), jnp.float32)

    params = init_mlp_params(key, input_size, layer_sizes, num_classes)

    fwd = jax.jit(mlp_forward)
    out = jax.block_until_ready(fwd(x, params))
    assert out.shape == (B, num_classes), out.shape

    # Pure-JAX reference with the same bf16-operand / f32-accumulate math.
    ref = x.reshape(B, -1)
    for i, (w, b) in enumerate(params):
        ref = jnp.dot(ref.astype(jnp.bfloat16), w.astype(jnp.bfloat16),
                      preferred_element_type=jnp.float32) + b
        if i != len(params) - 1:
            ref = jnp.maximum(ref, 0.0)
    assert jnp.allclose(out, ref, atol=1e-2, rtol=1e-2), (
        float(jnp.max(jnp.abs(out - ref))))

    # Sanity check against the full-f32 reference as well (looser, bf16 quantization).
    ref32 = x.reshape(B, -1)
    for i, (w, b) in enumerate(params):
        ref32 = ref32 @ w + b
        if i != len(params) - 1:
            ref32 = jnp.maximum(ref32, 0.0)
    assert jnp.allclose(out, ref32, atol=5e-2, rtol=5e-2)

    print("KERNEL_OK")
</pallas_src>

<mosaic_0001>
module attributes {stable_mosaic.version = 11 : i64} {
  func.func @_fused_mlp_kernel(%arg0: memref<2x1024xbf16, #tpu.memory_space<vmem>>, %arg1: memref<1024x128xbf16, #tpu.memory_space<vmem>>, %arg2: memref<1x128xf32, #tpu.memory_space<vmem>>, %arg3: memref<128x64xbf16, #tpu.memory_space<any>>, %arg4: memref<1x64xf32, #tpu.memory_space<vmem>>, %arg5: memref<64x128xbf16, #tpu.memory_space<any>>, %arg6: memref<1x128xf32, #tpu.memory_space<vmem>>, %arg7: memref<2x128xf32, #tpu.memory_space<vmem>>, %arg8: memref<128x64xbf16, #tpu.memory_space<vmem>>, %arg9: memref<64x128xbf16, #tpu.memory_space<vmem>>, %arg10: memref<2x!tpu.dma_semaphore, #tpu.memory_space<semaphore_mem>>) attributes {dimension_semantics = [], scalar_prefetch = 0 : i64, scratch_operands = 3 : i64, tpu.core_type = #tpu.core_type<tc>} {
    %c0_i32 = arith.constant 0 : i32
    %0 = tpu.memref_slice %arg10[%c0_i32] : memref<2x!tpu.dma_semaphore, #tpu.memory_space<semaphore_mem>> -> memref<1x!tpu.dma_semaphore, #tpu.memory_space<semaphore_mem>>
    %1 = tpu.memref_squeeze %0 : memref<1x!tpu.dma_semaphore, #tpu.memory_space<semaphore_mem>> -> memref<!tpu.dma_semaphore, #tpu.memory_space<semaphore_mem>>
    tpu.enqueue_dma source(%arg3 : memref<128x64xbf16, #tpu.memory_space<any>>) target(%arg8 : memref<128x64xbf16, #tpu.memory_space<vmem>>) target_semaphore(%1 : memref<!tpu.dma_semaphore, #tpu.memory_space<semaphore_mem>>)
    %c1_i32 = arith.constant 1 : i32
    %2 = tpu.memref_slice %arg10[%c1_i32] : memref<2x!tpu.dma_semaphore, #tpu.memory_space<semaphore_mem>> -> memref<1x!tpu.dma_semaphore, #tpu.memory_space<semaphore_mem>>
    %3 = tpu.memref_squeeze %2 : memref<1x!tpu.dma_semaphore, #tpu.memory_space<semaphore_mem>> -> memref<!tpu.dma_semaphore, #tpu.memory_space<semaphore_mem>>
    tpu.enqueue_dma source(%arg5 : memref<64x128xbf16, #tpu.memory_space<any>>) target(%arg9 : memref<64x128xbf16, #tpu.memory_space<vmem>>) target_semaphore(%3 : memref<!tpu.dma_semaphore, #tpu.memory_space<semaphore_mem>>)
    %c0 = arith.constant 0 : index
    %c0_0 = arith.constant 0 : index
    %4 = vector.load %arg0[%c0, %c0_0] : memref<2x1024xbf16, #tpu.memory_space<vmem>>, vector<2x1024xbf16>
    %c0_1 = arith.constant 0 : index
    %c0_2 = arith.constant 0 : index
    %5 = vector.load %arg1[%c0_1, %c0_2] : memref<1024x128xbf16, #tpu.memory_space<vmem>>, vector<1024x128xbf16>
    %cst = arith.constant dense<0.000000e+00> : vector<2x128xf32>
    %6 = tpu.matmul %4, %5, %cst {dimension_numbers = #tpu.dot_dimension_numbers<[1], [0], [0], [1], [0, 0, 1, 1], [], []>} : vector<2x1024xbf16>, vector<1024x128xbf16>, vector<2x128xf32> -> vector<2x128xf32>
    %c0_3 = arith.constant 0 : index
    %c0_4 = arith.constant 0 : index
    %7 = vector.load %arg2[%c0_3, %c0_4] : memref<1x128xf32, #tpu.memory_space<vmem>>, vector<1x128xf32>
    %8 = vector.broadcast %7 : vector<1x128xf32> to vector<2x128xf32>
    %9 = arith.addf %6, %8 : vector<2x128xf32>
    %cst_5 = arith.constant 0.000000e+00 : f32
    %10 = vector.broadcast %cst_5 : f32 to vector<2x128xf32>
    %11 = arith.maximumf %9, %10 : vector<2x128xf32>
    %c0_i32_6 = arith.constant 0 : i32
    %12 = tpu.memref_slice %arg10[%c0_i32_6] : memref<2x!tpu.dma_semaphore, #tpu.memory_space<semaphore_mem>> -> memref<1x!tpu.dma_semaphore, #tpu.memory_space<semaphore_mem>>
    %13 = tpu.memref_squeeze %12 : memref<1x!tpu.dma_semaphore, #tpu.memory_space<semaphore_mem>> -> memref<!tpu.dma_semaphore, #tpu.memory_space<semaphore_mem>>
    tpu.wait_dma2 semaphore(%13 : memref<!tpu.dma_semaphore, #tpu.memory_space<semaphore_mem>>) src(%arg3 : memref<128x64xbf16, #tpu.memory_space<any>>) dst(%arg8 : memref<128x64xbf16, #tpu.memory_space<vmem>>)
    %c0_7 = arith.constant 0 : index
    %c0_8 = arith.constant 0 : index
    %14 = vector.load %arg8[%c0_7, %c0_8] : memref<128x64xbf16, #tpu.memory_space<vmem>>, vector<128x64xbf16>
    %15 = arith.truncf %11 : vector<2x128xf32> to vector<2x128xbf16>
    %cst_9 = arith.constant dense<0.000000e+00> : vector<2x64xf32>
    %16 = tpu.matmul %15, %14, %cst_9 {dimension_numbers = #tpu.dot_dimension_numbers<[1], [0], [0], [1], [0, 0, 1, 1], [], []>} : vector<2x128xbf16>, vector<128x64xbf16>, vector<2x64xf32> -> vector<2x64xf32>
    %c0_10 = arith.constant 0 : index
    %c0_11 = arith.constant 0 : index
    %17 = vector.load %arg4[%c0_10, %c0_11] : memref<1x64xf32, #tpu.memory_space<vmem>>, vector<1x64xf32>
    %18 = vector.broadcast %17 : vector<1x64xf32> to vector<2x64xf32>
    %19 = arith.addf %16, %18 : vector<2x64xf32>
    %cst_12 = arith.constant 0.000000e+00 : f32
    %20 = vector.broadcast %cst_12 : f32 to vector<2x64xf32>
    %21 = arith.maximumf %19, %20 : vector<2x64xf32>
    %c1_i32_13 = arith.constant 1 : i32
    %22 = tpu.memref_slice %arg10[%c1_i32_13] : memref<2x!tpu.dma_semaphore, #tpu.memory_space<semaphore_mem>> -> memref<1x!tpu.dma_semaphore, #tpu.memory_space<semaphore_mem>>
    %23 = tpu.memref_squeeze %22 : memref<1x!tpu.dma_semaphore, #tpu.memory_space<semaphore_mem>> -> memref<!tpu.dma_semaphore, #tpu.memory_space<semaphore_mem>>
    tpu.wait_dma2 semaphore(%23 : memref<!tpu.dma_semaphore, #tpu.memory_space<semaphore_mem>>) src(%arg5 : memref<64x128xbf16, #tpu.memory_space<any>>) dst(%arg9 : memref<64x128xbf16, #tpu.memory_space<vmem>>)
    %c0_14 = arith.constant 0 : index
    %c0_15 = arith.constant 0 : index
    %24 = vector.load %arg9[%c0_14, %c0_15] : memref<64x128xbf16, #tpu.memory_space<vmem>>, vector<64x128xbf16>
    %25 = arith.truncf %21 : vector<2x64xf32> to vector<2x64xbf16>
    %cst_16 = arith.constant dense<0.000000e+00> : vector<2x128xf32>
    %26 = tpu.matmul %25, %24, %cst_16 {dimension_numbers = #tpu.dot_dimension_numbers<[1], [0], [0], [1], [0, 0, 1, 1], [], []>} : vector<2x64xbf16>, vector<64x128xbf16>, vector<2x128xf32> -> vector<2x128xf32>
    %c0_17 = arith.constant 0 : index
    %c0_18 = arith.constant 0 : index
    %27 = vector.load %arg6[%c0_17, %c0_18] : memref<1x128xf32, #tpu.memory_space<vmem>>, vector<1x128xf32>
    %28 = vector.broadcast %27 : vector<1x128xf32> to vector<2x128xf32>
    %29 = arith.addf %26, %28 : vector<2x128xf32>
    %c0_19 = arith.constant 0 : index
    %c0_20 = arith.constant 0 : index
    %30 = vector.load %arg7[%c0_19, %c0_20] : memref<2x128xf32, #tpu.memory_space<vmem>>, vector<2x128xf32>
    tpu.vector_store %arg7[%c0_19, %c0_20], %29 {strides = array<i32>} : memref<2x128xf32, #tpu.memory_space<vmem>>, vector<2x128xf32>,
    return
  }
}

</mosaic_0001>

<bundles_post_ra>
// kernel: mlp_forward.1
= control target key start
LH: loop header
LB: loop body
LE: loop exit
PB: predicated region body
PF: predicated region fallthrough
CT: control target
= control target key end

     0   :  { %12 = vsyncpa [#allocation6], 0  ;;  %s1744_s0 = inlined_call_operand.vmem [shape: bf16[2,1024], index: 0, kind: input, shape index: {}]   ;;  %s1745_s1 = inlined_call_operand.vmem [shape: bf16[1024,128], index: 1, kind: input, shape index: {}]   ;;  %s1746_s2 = inlined_call_operand.vmem [shape: f32[1,128], index: 2, kind: input, shape index: {}]   ;;  %s1747_s3 = inlined_call_operand.vmem [shape: bf16[128,64], index: 3, kind: input, shape index: {}]   ;;  %s1748_s4 = inlined_call_operand.vmem [shape: f32[1,64], index: 4, kind: input, shape index: {}]   ;;  %s1749_s5 = inlined_call_operand.vmem [shape: bf16[64,128], index: 5, kind: input, shape index: {}]   ;;  %s1750_s6 = inlined_call_operand.vmem [shape: f32[1,128], index: 6, kind: input, shape index: {}]   ;;  %s1751_s7 = inlined_call_operand.hbm [shape: f32[2,128], index: 7, kind: output, shape index: {}]  }
   0x1   :  { %v57_v0 = vld [vmem:[%s1747_s3] sm:$0xff]  ;;  %v59_v1 = vld [vmem:[%s1747_s3 + $0x8] sm:$0xff]  ;;  %v61_v2 = vld [vmem:[%s1747_s3 + $0x10] sm:$0xff] }
   0x2   :  { %58 = vst [vmem:[#allocation2] sm:$0xff] %v57_v0  ;;  %60 = vst [vmem:[#allocation2 + $0x8] sm:$0xff] %v59_v1  ;;  %v63_v3 = vld [vmem:[%s1747_s3 + $0x18] sm:$0xff]  ;;  %v65_v4 = vld [vmem:[%s1747_s3 + $0x20] sm:$0xff] }
   0x3   :  { %62 = vst [vmem:[#allocation2 + $0x10] sm:$0xff] %v61_v2  ;;  %64 = vst [vmem:[#allocation2 + $0x18] sm:$0xff] %v63_v3  ;;  %v67_v5 = vld [vmem:[%s1747_s3 + $0x28] sm:$0xff]  ;;  %v69_v6 = vld [vmem:[%s1747_s3 + $0x30] sm:$0xff] }
   0x4   :  { %66 = vst [vmem:[#allocation2 + $0x20] sm:$0xff] %v65_v4  ;;  %v71_v7 = vld [vmem:[%s1747_s3 + $0x38] sm:$0xff]  ;;  %68 = vst [vmem:[#allocation2 + $0x28] sm:$0xff] %v67_v5 }
   0x5   :  { %70 = vst [vmem:[#allocation2 + $0x30] sm:$0xff] %v69_v6  ;;  %72 = vst [vmem:[#allocation2 + $0x38] sm:$0xff] %v71_v7 }
   0x6   :  { %80 = vsyncadd [#allocation4], 1024  ;;  %v115_v8 = vld [vmem:[%s1749_s5] sm:$0xff]  ;;  %v117_v9 = vld [vmem:[%s1749_s5 + $0x8] sm:$0xff] }
   0x7   :  { %116 = vst [vmem:[#allocation3] sm:$0xff] %v115_v8  ;;  %118 = vst [vmem:[#allocation3 + $0x8] sm:$0xff] %v117_v9  ;;  %v119_v10 = vld [vmem:[%s1749_s5 + $0x10] sm:$0xff]  ;;  %v121_v11 = vld [vmem:[%s1749_s5 + $0x18] sm:$0xff] }
   0x8   :  { %120 = vst [vmem:[#allocation3 + $0x10] sm:$0xff] %v119_v10  ;;  %122 = vst [vmem:[#allocation3 + $0x18] sm:$0xff] %v121_v11 }
   0x9   :  { %130 = vsyncadd [#allocation4 + $0x1], 512  ;;  %v1339_v12 = vld [vmem:[%s1745_s1 + $0x78] sm:$0xff]   ;;  %v1343_v16 = vld [vmem:[%s1745_s1 + $0x70] sm:$0xff]   ;;  %v272_v41 = vlaneseq  ;;  %v1442_v46 = vmov 1966171168  }
   0xa   :  { %v1340_v13 = vld [vmem:[%s1745_s1 + $0xf8] sm:$0xff]   ;;  %1201 = vmatprep.subr.bf16.mxu0 %v1339_v12  ;;  %v1344_v17 = vld [vmem:[%s1745_s1 + $0xf0] sm:$0xff]   ;;  %v1347_v20 = vld [vmem:[%s1745_s1 + $0x68] sm:$0xff]   ;;  %v270_v47 = vunpack.c.l.s4 %v1442_v46 }
   0xb   :  { %v1341_v14 = vld [vmem:[%s1745_s1 + $0x38] sm:$0xff]   ;;  %1223 = vmatprep.subr.bf16.mxu1 %v1340_v13  ;;  %v1345_v18 = vld [vmem:[%s1745_s1 + $0x30] sm:$0xff]   ;;  %v1348_v21 = vld [vmem:[%s1745_s1 + $0xe8] sm:$0xff]   ;;  %v273_v48 = vshrl.u32 %v272_v41, 7 }
   0xc   :  { %v1342_v15 = vld [vmem:[%s1745_s1 + $0xb8] sm:$0xff]   ;;  %1202 = vmatpush3.bf16.msra.mxu0 %v1341_v14  ;;  %v1346_v19 = vld [vmem:[%s1745_s1 + $0xb0] sm:$0xff]   ;;  %v1349_v22 = vld [vmem:[%s1745_s1 + $0x28] sm:$0xff]   ;;  %v271_v52 = vunpack.c.0.s8 %v270_v47 }
   0xd   :  { %1224 = vmatpush3.bf16.msra.mxu1 %v1342_v15  ;;  %1203 = vmatprep.subr.bf16.mxu0 %v1343_v16  ;;  %v1350_v23 = vld [vmem:[%s1745_s1 + $0xa8] sm:$0xff]   ;;  %v1351_v24 = vld [vmem:[%s1745_s1 + $0x60] sm:$0xff]   ;;  %v1355_v28 = vld [vmem:[%s1745_s1 + $0x58] sm:$0xff]  }
   0xe   :  { %1225 = vmatprep.subr.bf16.mxu1 %v1344_v17  ;;  %v1352_v25 = vld [vmem:[%s1745_s1 + $0xe0] sm:$0xff]   ;;  %v1356_v29 = vld [vmem:[%s1745_s1 + $0xd8] sm:$0xff]   ;;  %v1359_v32 = vld [vmem:[%s1745_s1 + $0x50] sm:$0xff]   ;;  %v1627_v53 = vsub.s32 %v271_v52, %v273_v48 }
   0xf   :  { %v1353_v26 = vld [vmem:[%s1745_s1 + $0x20] sm:$0xff]   ;;  %v1357_v30 = vld [vmem:[%s1745_s1 + $0x18] sm:$0xff]   ;;  %v1360_v33 = vld [vmem:[%s1745_s1 + $0xd0] sm:$0xff]  }
  0x10   :  { %1204 = vmatpush3.bf16.msra.mxu0 %v1345_v18  ;;  %v1354_v27 = vld [vmem:[%s1745_s1 + $0xa0] sm:$0xff]   ;;  %v1358_v31 = vld [vmem:[%s1745_s1 + $0x98] sm:$0xff]   ;;  %v1361_v34 = vld [vmem:[%s1745_s1 + $0x10] sm:$0xff]  }
  0x11   :  { %1226 = vmatpush3.bf16.msra.mxu1 %v1346_v19  ;;  %1205 = vmatprep.subr.bf16.mxu0 %v1347_v20  ;;  %v1362_v35 = vld [vmem:[%s1745_s1 + $0x90] sm:$0xff]   ;;  %v1363_v36 = vld [vmem:[%s1745_s1 + $0x48] sm:$0xff]   ;;  %v1367_v40 = vld [vmem:[%s1745_s1 + $0x40] sm:$0xff]  }
  0x12   :  { %1227 = vmatprep.subr.bf16.mxu1 %v1348_v21  ;;  %v1364_v37 = vld [vmem:[%s1745_s1 + $0xc8] sm:$0xff]   ;;  %v1368_v42 = vld [vmem:[%s1745_s1 + $0xc0] sm:$0xff]   ;;  %v1372_v49 = vld [vmem:[%s1745_s1 + $0x178] sm:$0xff]  }
  0x13   :  { %v1365_v38 = vld [vmem:[%s1745_s1 + $0x8] sm:$0xff]   ;;  %v1369_v43 = vld [vmem:[%s1745_s1] sm:$0xff]   ;;  %v1373_v50 = vld [vmem:[%s1745_s1 + $0x1f8] sm:$0xff]  }
  0x14   :  { %1206 = vmatpush3.bf16.msra.mxu0 %v1349_v22  ;;  %v1366_v39 = vld [vmem:[%s1745_s1 + $0x88] sm:$0xff]   ;;  %v1370_v44 = vld [vmem:[%s1745_s1 + $0x80] sm:$0xff]   ;;  %v1374_v60 = vld [vmem:[%s1745_s1 + $0x138] sm:$0xff]  }
  0x15   :  { %1228 = vmatpush3.bf16.msra.mxu1 %v1350_v23  ;;  %1207 = vmatprep.subr.bf16.mxu0 %v1351_v24  ;;  %v131_v45 = vld [vmem:[%s1744_s0] sm:$0xff]  ;;  %v1376_v63 = vld [vmem:[%s1745_s1 + $0x170] sm:$0xff]   ;;  %v1375_v1 = vld [vmem:[%s1745_s1 + $0x1b8] sm:$0xff]  }
  0x16   :  { %1229 = vmatprep.subr.bf16.mxu1 %v1352_v25  ;;  %v268_v51 = vcombine.high %v131_v45, %v131_v45  ;;  %v275_v54 = vrot.slane %v131_v45, %v1627_v53  ;;  %v1377_v2 = vld [vmem:[%s1745_s1 + $0x1f0] sm:$0xff]   ;;  %v1380_v5 = vld [vmem:[%s1745_s1 + $0x168] sm:$0xff]   ;;  %v1384_v9 = vld [vmem:[%s1745_s1 + $0x160] sm:$0xff]  }
  0x17   :  { %v1378_v4 = vld [vmem:[%s1745_s1 + $0x130] sm:$0xff]   ;;  %v1381_v7 = vld [vmem:[%s1745_s1 + $0x1e8] sm:$0xff]   ;;  %v1385_v11 = vld [vmem:[%s1745_s1 + $0x1e0] sm:$0xff]  }
  0x18   :  { %1208 = vmatpush3.bf16.msra.mxu0 %v1353_v26  ;;  %v1631_v55 = vrot.slane %v268_v51, %v1627_v53  ;;  %v283_v56 = vcombine.high %v275_v54, %v275_v54  ;;  %v291_v57 = vrot.slane %v275_v54, %v1627_v53  ;;  %v1379_v6 = vld [vmem:[%s1745_s1 + $0x1b0] sm:$0xff]   ;;  %v1382_v8 = vld [vmem:[%s1745_s1 + $0x128] sm:$0xff]   ;;  %v1386_v12 = vld [vmem:[%s1745_s1 + $0x120] sm:$0xff]  }
  0x19   :  { %1230 = vmatpush3.bf16.msra.mxu1 %v1354_v27  ;;  %1209 = vmatprep.subr.bf16.mxu0 %v1355_v28  ;;  %v1383_v10 = vld [vmem:[%s1745_s1 + $0x1a8] sm:$0xff]   ;;  %v1388_v13 = vld [vmem:[%s1745_s1 + $0x158] sm:$0xff]   ;;  %v1387_v14 = vld [vmem:[%s1745_s1 + $0x1a0] sm:$0xff]  }
  0x1a   :  { %1231 = vmatprep.subr.bf16.mxu1 %v1356_v29  ;;  %v284_v58 = vcombine.high %v1631_v55, %v1631_v55  ;;  %v305_v59 = vrot.slane %v283_v56, %v1627_v53  ;;  %v313_v62 = vcombine.high %v291_v57, %v291_v57  ;;  %v1389_v15 = vld [vmem:[%s1745_s1 + $0x1d8] sm:$0xff]   ;;  %v1392_v17 = vld [vmem:[%s1745_s1 + $0x150] sm:$0xff]   ;;  %v1396_v21 = vld [vmem:[%s1745_s1 + $0x148] sm:$0xff]   ;;  %v298_v29 = vrot.slane %v1631_v55, %v1627_v53 }
  0x1b   :  { %v1390_v16 = vld [vmem:[%s1745_s1 + $0x118] sm:$0xff]   ;;  %v1393_v19 = vld [vmem:[%s1745_s1 + $0x1d0] sm:$0xff]   ;;  %v1397_v23 = vld [vmem:[%s1745_s1 + $0x1c8] sm:$0xff]  }
  0x1c   :  { %1210 = vmatpush3.bf16.msra.mxu0 %v1357_v30  ;;  %v312_v61 = vrot.slane %v284_v58, %v1627_v53  ;;  %741 = vmatprep.mubr.bf16.mxu0 %v305_v59  ;;  %v315_v0 = vcombine.high %v305_v59, %v305_v59  ;;  %v1391_v18 = vld [vmem:[%s1745_s1 + $0x198] sm:$0xff]   ;;  %v1394_v20 = vld [vmem:[%s1745_s1 + $0x110] sm:$0xff]   ;;  %v1398_v24 = vld [vmem:[%s1745_s1 + $0x108] sm:$0xff]  }
  0x1d   :  { %1232 = vmatpush3.bf16.msra.mxu1 %v1358_v31  ;;  %1211 = vmatprep.subr.bf16.mxu0 %v1359_v32  ;;  %v1395_v22 = vld [vmem:[%s1745_s1 + $0x190] sm:$0xff]   ;;  %v1400_v25 = vld [vmem:[%s1745_s1 + $0x140] sm:$0xff]   ;;  %v1399_v26 = vld [vmem:[%s1745_s1 + $0x188] sm:$0xff]   ;;  %v314_v31 = vcombine.high %v298_v29, %v298_v29 }
  0x1e   :  { %1233 = vmatprep.subr.bf16.mxu1 %v1360_v33  ;;  %v316_v3 = vcombine.high %v312_v61, %v312_v61  ;;  %781 = vmatprep.mubr.bf16.mxu1 %v315_v0  ;;  %v1401_v27 = vld [vmem:[%s1745_s1 + $0x1c0] sm:$0xff]  }
  0x1f   :  { %v1402_v28 = vld [vmem:[%s1745_s1 + $0x100] sm:$0xff]  }
  0x20   :  { %1212 = vmatpush3.bf16.msra.mxu0 %v1361_v34  ;;  %v1403_v30 = vld [vmem:[%s1745_s1 + $0x180] sm:$0xff]  }
  0x21   :  { %1234 = vmatpush3.bf16.msra.mxu1 %v1362_v35  ;;  %1213 = vmatprep.subr.bf16.mxu0 %v1363_v36  ;;  %v1119_v41 = vld [vmem:[%s1746_s2] ss:$0 sm:$0xff] }
  0x22   :  { %1235 = vmatprep.subr.bf16.mxu1 %v1364_v37 }
  0x24   :  { %1214 = vmatpush3.bf16.msra.mxu0 %v1365_v38 }
  0x25   :  { %1236 = vmatpush3.bf16.msra.mxu1 %v1366_v39  ;;  %1215 = vmatprep.subr.bf16.mxu0 %v1367_v40 }
  0x26   :  { %1237 = vmatprep.subr.bf16.mxu1 %v1368_v42 }
  0x28   :  { %1216 = vmatpush3.bf16.msra.mxu0 %v1369_v43 }
  0x29   :  { %1238 = vmatpush3.bf16.msra.mxu1 %v1370_v44  ;;  %1245 = vmatprep.subr.bf16.mxu0 %v1372_v49 }
  0x2a   :  { %1267 = vmatprep.subr.bf16.mxu1 %v1373_v50 }
  0x2b   :  { %742 = vmatmul.mubr.bf16.vlgmr.msra.gmra.mxu0 %v291_v57 }
  0x2c   :  { %1246 = vmatpush3.bf16.msra.mxu0 %v1374_v60  ;;  %782 = vmatmul.mubr.bf16.vlgmr.msra.gmra.mxu1 %v313_v62 }
  0x2d   :  { %1247 = vmatprep.subr.bf16.mxu0 %v1376_v63  ;;  %1268 = vmatpush3.bf16.msra.mxu1 %v1375_v1 }
  0x2e   :  { %821 = vmatprep.mubr.bf16.mxu0 %v312_v61  ;;  %1269 = vmatprep.subr.bf16.mxu1 %v1377_v2 }
  0x2f   :  { %861 = vmatprep.mubr.bf16.mxu1 %v316_v3 }
  0x30   :  { %1248 = vmatpush3.bf16.msra.mxu0 %v1378_v4 }
  0x31   :  { %1249 = vmatprep.subr.bf16.mxu0 %v1380_v5  ;;  %1270 = vmatpush3.bf16.msra.mxu1 %v1379_v6 }
  0x32   :  { %1271 = vmatprep.subr.bf16.mxu1 %v1381_v7 }
  0x34   :  { %1250 = vmatpush3.bf16.msra.mxu0 %v1382_v8 }
  0x35   :  { %1251 = vmatprep.subr.bf16.mxu0 %v1384_v9  ;;  %1272 = vmatpush3.bf16.msra.mxu1 %v1383_v10 }
  0x36   :  { %1273 = vmatprep.subr.bf16.mxu1 %v1385_v11 }
  0x38   :  { %1252 = vmatpush3.bf16.msra.mxu0 %v1386_v12 }
  0x39   :  { %1253 = vmatprep.subr.bf16.mxu0 %v1388_v13  ;;  %1274 = vmatpush3.bf16.msra.mxu1 %v1387_v14 }
  0x3a   :  { %1275 = vmatprep.subr.bf16.mxu1 %v1389_v15 }
  0x3c   :  { %1254 = vmatpush3.bf16.msra.mxu0 %v1390_v16 }
  0x3d   :  { %1255 = vmatprep.subr.bf16.mxu0 %v1392_v17  ;;  %1276 = vmatpush3.bf16.msra.mxu1 %v1391_v18 }
  0x3e   :  { %1277 = vmatprep.subr.bf16.mxu1 %v1393_v19 }
  0x40   :  { %1256 = vmatpush3.bf16.msra.mxu0 %v1394_v20 }
  0x41   :  { %1257 = vmatprep.subr.bf16.mxu0 %v1396_v21  ;;  %1278 = vmatpush3.bf16.msra.mxu1 %v1395_v22 }
  0x42   :  { %1279 = vmatprep.subr.bf16.mxu1 %v1397_v23 }
  0x44   :  { %1258 = vmatpush3.bf16.msra.mxu0 %v1398_v24 }
  0x45   :  { %1259 = vmatprep.subr.bf16.mxu0 %v1400_v25  ;;  %1280 = vmatpush3.bf16.msra.mxu1 %v1399_v26 }
  0x46   :  { %1281 = vmatprep.subr.bf16.mxu1 %v1401_v27 }
  0x48   :  { %1260 = vmatpush3.bf16.msra.mxu0 %v1402_v28 }
  0x49   :  { %1282 = vmatpush3.bf16.msra.mxu1 %v1403_v30 }
  0x4b   :  { %822 = vmatmul.mubr.bf16.vlgmr.msra.gmra.mxu0 %v298_v29 }
  0x4c   :  { %862 = vmatmul.mubr.bf16.vlgmr.msra.gmra.mxu1 %v314_v31 }
  0xeb   :  { %v1217_v32 = vpop.f32.mrf.mxu0 }
  0xec   :  { %v1239_v33 = vpop.f32.mrf.mxu1 }
  0xed   :  { %v1218_v34 = vpop.f32.mrf.mxu0 }
  0xee   :  { %v1240_v35 = vpop.f32.mrf.mxu1  ;;  %v1219_v40 = vadd.f32 %v1218_v34, %v1217_v32 }
  0xef   :  { %v1220_v36 = vpop.f32.mrf.mxu0  ;;  %v1241_v43 = vadd.f32 %v1240_v35, %v1239_v33 }
  0xf0   :  { %v1242_v37 = vpop.f32.mrf.mxu1  ;;  %v744_v42 = vadd.f32 %v1219_v40, %v1119_v41 }
  0xf1   :  { %v1221_v38 = vpop.f32.mrf.mxu0 }
  0xf2   :  { %v1243_v39 = vpop.f32.mrf.mxu1  ;;  %v784_v47 = vadd.f32 %v1241_v43, %v744_v42 }
 0x10b   :  { %v1261_v44 = vpop.f32.mrf.mxu0 }
 0x10c   :  { %v1283_v45 = vpop.f32.mrf.mxu1 }
 0x10d   :  { %v1262_v46 = vpop.f32.mrf.mxu0 }
 0x10e   :  { %v1263_v48 = vadd.f32 %v1262_v46, %v1261_v44  ;;  %v1284_v49 = vpop.f32.mrf.mxu1 }
 0x10f   :  { %v1264_v50 = vpop.f32.mrf.mxu0  ;;  %v1285_v52 = vadd.f32 %v1284_v49, %v1283_v45 }
 0x110   :  { %v824_v51 = vadd.f32 %v1263_v48, %v784_v47  ;;  %v1286_v53 = vpop.f32.mrf.mxu1 }
 0x111   :  { %v1265_v54 = vpop.f32.mrf.mxu0 }
 0x112   :  { %v864_v55 = vadd.f32 %v1285_v52, %v824_v51  ;;  %v1287_v56 = vpop.f32.mrf.mxu1 }
 0x114   :  { %v869_v57 = vmax.f32 %v864_v55, 0.0 }
 0x115   :  { %1436 = dma.done.wait [#allocation4], 1024 }
 0x116   :  { %1437 = vsyncadd [#allocation4], 4294966272  ;;  %v1443_v58 = vmov 0.0   ;;  %vm1444_vm0 = vmmov 0   ;;  %v1404_v59 = vld [vmem:[#allocation2 + $0x38] sm:$0xff]   ;;  %v1405_v60 = vld [vmem:[#allocation2 + $0x30] sm:$0xff]   ;;  %v890_v3 = vpack.c.bf16 %v869_v57, %v869_v57 }
 0x117   :  { %1303 = vmatprep.subr.bf16.mxu0 %v1443_v58  ;;  %1319 = vmatprep.mubr.msk.bf16.mxu0 %vm1444_vm0, %v1443_v58  ;;  %v1406_v61 = vld [vmem:[#allocation2 + $0x28] sm:$0xff]   ;;  %v1407_v62 = vld [vmem:[#allocation2 + $0x20] sm:$0xff]   ;;  %v1408_v63 = vld [vmem:[#allocation2 + $0x18] sm:$0xff]  }
 0x118   :  { %1304 = vmatpush3.bf16.msra.mxu0 %v1404_v59  ;;  %v1409_v0 = vld [vmem:[#allocation2 + $0x10] sm:$0xff]   ;;  %v1410_v1 = vld [vmem:[#allocation2 + $0x8] sm:$0xff]   ;;  %v1411_v2 = vld [vmem:[#allocation2] sm:$0xff]  }
 0x119   :  { %1305 = vmatprep.subr.bf16.mxu0 %v1443_v58  ;;  %v1184_v4 = vld [vmem:[%s1748_s4] ss:$0 sm:$0xff] }
 0x11c   :  { %1306 = vmatpush3.bf16.msra.mxu0 %v1405_v60 }
 0x11d   :  { %1307 = vmatprep.subr.bf16.mxu0 %v1443_v58 }
 0x120   :  { %1308 = vmatpush3.bf16.msra.mxu0 %v1406_v61 }
 0x121   :  { %1309 = vmatprep.subr.bf16.mxu0 %v1443_v58 }
 0x124   :  { %1310 = vmatpush3.bf16.msra.mxu0 %v1407_v62 }
 0x125   :  { %1311 = vmatprep.subr.bf16.mxu0 %v1443_v58 }
 0x128   :  { %1312 = vmatpush3.bf16.msra.mxu0 %v1408_v63 }
 0x129   :  { %1313 = vmatprep.subr.bf16.mxu0 %v1443_v58 }
 0x12c   :  { %1314 = vmatpush3.bf16.msra.mxu0 %v1409_v0 }
 0x12d   :  { %1315 = vmatprep.subr.bf16.mxu0 %v1443_v58 }
 0x130   :  { %1316 = vmatpush3.bf16.msra.mxu0 %v1410_v1 }
 0x131   :  { %1317 = vmatprep.subr.bf16.mxu0 %v1443_v58 }
 0x134   :  { %1318 = vmatpush3.bf16.msra.mxu0 %v1411_v2 }
 0x137   :  { %1320 = vmatmul.mubr.bf16.vlgmr.msra.gmra.mxu0 %v890_v3 }
 0x1f7   :  { %v980_v5 = vpop.f32.mrf.mxu0 }
 0x1f8   :  { %v981_v6 = vadd.f32 %v1184_v4, %v980_v5 }
 0x1f9   :  { %v1321_v7 = vpop.f32.mrf.mxu0 }
 0x1fa   :  { %v986_v8 = vmax.f32 %v981_v6, 0.0 }
 0x1fb   :  { %v983_v9 = vpop.f32.mrf.mxu0 }
 0x1fd   :  { %v1322_v10 = vpop.f32.mrf.mxu0 }
 0x1fe   :  { %1438 = dma.done.wait [#allocation4 + $0x1], 512 }
 0x1ff   :  { %1439 = vsyncadd [#allocation4 + $0x1], 4294966784  ;;  %1323 = vmatprep.subr.bf16.mxu1 %v1443_v58  ;;  %1331 = vmatprep.mubr.msk.bf16.mxu1 %vm1444_vm0, %v1443_v58  ;;  %v1412_v11 = vld [vmem:[#allocation3 + $0x18] sm:$0xff]   ;;  %v1413_v12 = vld [vmem:[#allocation3 + $0x10] sm:$0xff]   ;;  %v999_v15 = vpack.c.bf16 %v986_v8, %v986_v8  ;;  %vm1031_vm1 = vcmask 523264   ;;  %s1445_s29 = smov [#allocation5]  }
 0x200   :  { %1324 = vmatpush3.bf16.msra.mxu1 %v1412_v11  ;;  %v1414_v13 = vld [vmem:[#allocation3 + $0x8] sm:$0xff]   ;;  %v1415_v14 = vld [vmem:[#allocation3] sm:$0xff]   ;;  %s1082_s30 = sshll.u32 %s1445_s29, 4  ;;  %s1083_s30 = int_to_ptr.vmem [resolvable:$true] %s1082_s30 }
 0x201   :  { %1325 = vmatprep.subr.bf16.mxu1 %v1443_v58  ;;  %v1193_v16 = vld [vmem:[%s1750_s6] ss:$0 sm:$0xff]  ;;  %s1416_s8 = scalar_lea.vmem %s1083_s30, 32  ;;  %p1421_p1 = scmp.lt.s32.totalorder %s1083_s30, %s1083_s30 }
 0x202   :  { %p1417_p0 = scmp.ne.s32.totalorder %s1083_s30, %s1416_s8  ;;  %p1422_p2 = scmp.lt.s32.totalorder %s1416_s8, %s1416_s8 }
 0x204   :  { %1326 = vmatpush3.bf16.msra.mxu1 %v1413_v12  ;;  %p1423_p3 = por %p1422_p2, %p1421_p1 }
 0x205   :  { %1327 = vmatprep.subr.bf16.mxu1 %v1443_v58 }
 0x206   :  { %p1424_p4 = pnand %p1423_p3, %p1417_p0 }
 0x208   :  { %1328 = vmatpush3.bf16.msra.mxu1 %v1414_v13 }
 0x209   :  { %1329 = vmatprep.subr.bf16.mxu1 %v1443_v58 }
 0x20c   :  { %1330 = vmatpush3.bf16.msra.mxu1 %v1415_v14 }
 0x20f   :  { %1332 = vmatmul.mubr.msk.bf16.vlgmr.msra.gmra.mxu1 %vm1031_vm1, %v999_v15 }
 0x2cf   :  { %v1069_v17 = vpop.f32.mrf.mxu1 }
 0x2d0   :  { %v1070_v18 = vadd.f32 %v1193_v16, %v1069_v17 }
 0x2d1   :  { %v1333_v19 = vpop.f32.mrf.mxu1 }
 0x2d2   :  { %1075 = vst [vmem:[#allocation5] sm:$0x3] %v1070_v18 }
 0x2d3   :  { %v1072_v20 = vpop.f32.mrf.mxu1 }
 0x2d4   :  { %1427 = shalt.err (!%p1424_p4)
}
 0x2d5   :  { %1085 = dma.vmem_to_hbm [thread:$0]  %s1083_s30, 32, %s1751_s7, [#allocation6]   ;;  %v1334_v21 = vpop.f32.mrf.mxu1 }
 0x2d6   :  { %1440 = dma.done.wait [#allocation6], 32  }
 0x2d7   :  { %1441 = vsyncadd [#allocation6], 4294967264 }
 0x2d8   :  { %1089 = vsyncpa [#allocation6], 1 }
 0x2d9   :  { %1090 = vsyncmov [#allocation4] }
 0x2dc   :  { %s1091_s6 = vpop.sfrf %1090 }
 0x2dd   :  { %p1199_p5 = scmp.ne.s32.totalorder %s1091_s6, 0 }
 0x2df   :  { %1095 = shalt.err (%p1199_p5)  }
 0x2e0   :  { %1097 = vsyncmov [#allocation4 + $0x1] }
 0x2e3   :  { %s1098_s10 = vpop.sfrf %1097 }
 0x2e4   :  { %p1200_p6 = scmp.ne.s32.totalorder %s1098_s10, 0 }
 0x2e6   :  { %1102 = shalt.err (%p1200_p6)  }

</bundles_post_ra>
